<compile_context>
chip_gen: v7x
topology: tpu7x:2x2x1
jax: 0.10.0
libtpu: 0.0.40
codegen_flags: <defaults>
</compile_context>

<pallas_src>
import functools

import jax
import jax.numpy as jnp
from jax.experimental import pallas as pl
from jax.experimental.pallas import tpu as pltpu


VMEM_LIMIT_BYTES = 48 * 1024 * 1024


# ----------------------------- helpers --------------------------------------

def _round_up(x, m):
    return (x + m - 1) // m * m


def _sublane(dtype):
    itemsize = jnp.dtype(dtype).itemsize
    return {4: 8, 2: 16, 1: 32}.get(itemsize, 8)


def _pick_row_tile(n_rows, tm, dtype):
    sub = _sublane(dtype)
    tm = max(sub, min(tm, _round_up(n_rows, sub)))
    return _round_up(tm, sub)


def _pad_rows(x2d, rows_padded):
    pad = rows_padded - x2d.shape[0]
    if pad == 0:
        return x2d
    return jnp.pad(x2d, ((0, pad), (0, 0)))


def _layernorm_f32(x_f32, g_ref, b_ref, eps):
    mean = jnp.mean(x_f32, axis=-1, keepdims=True)
    xc = x_f32 - mean
    var = jnp.mean(xc * xc, axis=-1, keepdims=True)
    y = xc * jax.lax.rsqrt(var + eps)
    return y * g_ref[...].astype(jnp.float32) + b_ref[...].astype(jnp.float32)


def _compiler_params(*semantics):
    return pltpu.CompilerParams(dimension_semantics=semantics,
                                vmem_limit_bytes=VMEM_LIMIT_BYTES)


# --------------------- fused LayerNorm + Q/K/V projections -------------------

def _norm_qkv_kernel(x_ref, g_ref, b_ref, wq_ref, wk_ref, wv_ref,
                     q_ref, k_ref, v_ref, *, eps):
    h = _layernorm_f32(x_ref[...].astype(jnp.float32), g_ref, b_ref, eps)
    h = h.astype(x_ref.dtype)                        # native dtype into the MXU
    q_ref[...] = jnp.dot(h, wq_ref[...],
                         preferred_element_type=jnp.float32).astype(q_ref.dtype)
    k_ref[...] = jnp.dot(h, wk_ref[...],
                         preferred_element_type=jnp.float32).astype(k_ref.dtype)
    v_ref[...] = jnp.dot(h, wv_ref[...],
                         preferred_element_type=jnp.float32).astype(v_ref.dtype)


def norm_qkv_pallas(x2d, gamma, beta, wq, wk, wv, *, eps=1e-5, tm=256):
    M, D = x2d.shape
    inner = wq.shape[1]
    tm = _pick_row_tile(M, tm, x2d.dtype)
    Mp = _round_up(M, tm)
    xp = _pad_rows(x2d, Mp)
    g = gamma.reshape(1, D)
    b = beta.reshape(1, D)
    out_struct = jax.ShapeDtypeStruct((Mp, inner), x2d.dtype)

    q, k, v = pl.pallas_call(
        functools.partial(_norm_qkv_kernel, eps=eps),
        out_shape=(out_struct, out_struct, out_struct),
        grid_spec=pltpu.PrefetchScalarGridSpec(
            num_scalar_prefetch=0,
            grid=(Mp // tm,),
            in_specs=[
                pl.BlockSpec((tm, D), lambda i: (i, 0)),
                pl.BlockSpec((1, D), lambda i: (0, 0)),
                pl.BlockSpec((1, D), lambda i: (0, 0)),
                pl.BlockSpec((D, inner), lambda i: (0, 0)),
                pl.BlockSpec((D, inner), lambda i: (0, 0)),
                pl.BlockSpec((D, inner), lambda i: (0, 0)),
            ],
            out_specs=[pl.BlockSpec((tm, inner), lambda i: (i, 0))] * 3,
        ),
        compiler_params=_compiler_params("parallel"),
    )(xp, g, b, wq, wk, wv)
    return q[:M], k[:M], v[:M]


# --------------------- fused LayerNorm + single projection -------------------

def _norm_linear_kernel(x_ref, g_ref, b_ref, w_ref, o_ref, *, eps):
    h = _layernorm_f32(x_ref[...].astype(jnp.float32), g_ref, b_ref, eps)
    h = h.astype(x_ref.dtype)
    o_ref[...] = jnp.dot(h, w_ref[...],
                         preferred_element_type=jnp.float32).astype(o_ref.dtype)


def norm_linear_pallas(x2d, gamma, beta, w, *, eps=1e-5, tm=256):
    M, D = x2d.shape
    N = w.shape[1]
    tm = _pick_row_tile(M, tm, x2d.dtype)
    Mp = _round_up(M, tm)
    xp = _pad_rows(x2d, Mp)
    g = gamma.reshape(1, D)
    b = beta.reshape(1, D)

    out = pl.pallas_call(
        functools.partial(_norm_linear_kernel, eps=eps),
        out_shape=jax.ShapeDtypeStruct((Mp, N), x2d.dtype),
        grid_spec=pltpu.PrefetchScalarGridSpec(
            num_scalar_prefetch=0,
            grid=(Mp // tm,),
            in_specs=[
                pl.BlockSpec((tm, D), lambda i: (i, 0)),
                pl.BlockSpec((1, D), lambda i: (0, 0)),
                pl.BlockSpec((1, D), lambda i: (0, 0)),
                pl.BlockSpec((D, N), lambda i: (0, 0)),
            ],
            out_specs=pl.BlockSpec((tm, N), lambda i: (i, 0)),
        ),
        compiler_params=_compiler_params("parallel"),
    )(xp, g, b, w)
    return out[:M]


# --------------------- dual projection (K and V from context) ----------------

def _dual_linear_kernel(x_ref, wa_ref, wb_ref, a_ref, b_ref):
    x = x_ref[...]
    a_ref[...] = jnp.dot(x, wa_ref[...],
                         preferred_element_type=jnp.float32).astype(a_ref.dtype)
    b_ref[...] = jnp.dot(x, wb_ref[...],
                         preferred_element_type=jnp.float32).astype(b_ref.dtype)


def dual_linear_pallas(x2d, wa, wb, *, tm=256):
    M, D = x2d.shape
    N = wa.shape[1]
    tm = _pick_row_tile(M, tm, x2d.dtype)
    Mp = _round_up(M, tm)
    xp = _pad_rows(x2d, Mp)
    out_struct = jax.ShapeDtypeStruct((Mp, N), x2d.dtype)

    a, b = pl.pallas_call(
        _dual_linear_kernel,
        out_shape=(out_struct, out_struct),
        grid_spec=pltpu.PrefetchScalarGridSpec(
            num_scalar_prefetch=0,
            grid=(Mp // tm,),
            in_specs=[
                pl.BlockSpec((tm, D), lambda i: (i, 0)),
                pl.BlockSpec((D, N), lambda i: (0, 0)),
                pl.BlockSpec((D, N), lambda i: (0, 0)),
            ],
            out_specs=[pl.BlockSpec((tm, N), lambda i: (i, 0))] * 2,
        ),
        compiler_params=_compiler_params("parallel"),
    )(xp, wa, wb)
    return a[:M], b[:M]


# --------------------- to_out projection + bias + residual -------------------

def _out_proj_residual_kernel(a_ref, w_ref, b_ref, res_ref, o_ref):
    acc = jnp.dot(a_ref[...], w_ref[...], preferred_element_type=jnp.float32)
    acc = acc + b_ref[...].astype(jnp.float32) + res_ref[...].astype(jnp.float32)
    o_ref[...] = acc.astype(o_ref.dtype)              # dropout p=0 -> identity


def out_proj_residual_pallas(a2d, w, bias, residual2d, *, tm=256):
    M, K = a2d.shape
    N = w.shape[1]
    tm = _pick_row_tile(M, tm, a2d.dtype)
    Mp = _round_up(M, tm)
    ap = _pad_rows(a2d, Mp)
    rp = _pad_rows(residual2d, Mp)
    br = bias.reshape(1, N)

    out = pl.pallas_call(
        _out_proj_residual_kernel,
        out_shape=jax.ShapeDtypeStruct((Mp, N), residual2d.dtype),
        grid_spec=pltpu.PrefetchScalarGridSpec(
            num_scalar_prefetch=0,
            grid=(Mp // tm,),
            in_specs=[
                pl.BlockSpec((tm, K), lambda i: (i, 0)),
                pl.BlockSpec((K, N), lambda i: (0, 0)),
                pl.BlockSpec((1, N), lambda i: (0, 0)),
                pl.BlockSpec((tm, N), lambda i: (i, 0)),
            ],
            out_specs=pl.BlockSpec((tm, N), lambda i: (i, 0)),
        ),
        compiler_params=_compiler_params("parallel"),
    )(ap, w, br, rp)
    return out[:M]


# ----------------------------- Attention --------------------------------------

def _mha_kernel(q_ref, k_ref, v_ref, o_ref, *, scale):
    q = q_ref[...]                  # (Nq, dh), native dtype into the MXU
    k = k_ref[...]                  # (Nk, dh)
    v = v_ref[...]                  # (Nk, dh)
    s = jax.lax.dot_general(q, k, (((1,), (1,)), ((), ())),
                            preferred_element_type=jnp.float32) * scale
    m = jnp.max(s, axis=-1, keepdims=True)
    p = jnp.exp(s - m)
    l = jnp.sum(p, axis=-1, keepdims=True)
    o = jnp.dot(p.astype(v.dtype), v, preferred_element_type=jnp.float32) / l
    o_ref[...] = o.astype(o_ref.dtype)


def mha_pallas(q, k, v, *, heads):
    """q: (B, Nq, H*dh), k/v: (B, Nk, H*dh). Softmax attention per (batch, head)."""
    # TODO(synk): for long sequences use the flash-attention pattern (kv grid axis
    # with online softmax) instead of full-sequence per-head attention.
    B, Nq, inner = q.shape
    _, Nk, _ = k.shape
    dh = inner // heads
    scale = dh ** -0.5

    def split_heads(t, n):
        return (t.reshape(B, n, heads, dh)
                 .transpose(0, 2, 1, 3)
                 .reshape(B * heads, n, dh))

    qh, kh, vh = split_heads(q, Nq), split_heads(k, Nk), split_heads(v, Nk)

    out = pl.pallas_call(
        functools.partial(_mha_kernel, scale=scale),
        out_shape=jax.ShapeDtypeStruct((B * heads, Nq, dh), q.dtype),
        grid_spec=pltpu.PrefetchScalarGridSpec(
            num_scalar_prefetch=0,
            grid=(B * heads,),
            in_specs=[
                pl.BlockSpec((None, Nq, dh), lambda b: (b, 0, 0)),
                pl.BlockSpec((None, Nk, dh), lambda b: (b, 0, 0)),
                pl.BlockSpec((None, Nk, dh), lambda b: (b, 0, 0)),
            ],
            out_specs=pl.BlockSpec((None, Nq, dh), lambda b: (b, 0, 0)),
        ),
        compiler_params=_compiler_params("parallel"),
    )(qh, kh, vh)

    return (out.reshape(B, heads, Nq, dh)
               .transpose(0, 2, 1, 3)
               .reshape(B, Nq, inner))


# ------------------- fused norm3 + GEGLU FeedForward + residual ----------------

def _norm_ff_geglu_res_kernel(x_ref, g_ref, b_ref, wv_ref, bv_ref, wg_ref, bg_ref,
                              w2_ref, b2_ref, o_ref, h_ref, acc_ref, *, eps):
    k = pl.program_id(1)

    @pl.when(k == 0)
    def _():
        h = _layernorm_f32(x_ref[...].astype(jnp.float32), g_ref, b_ref, eps)
        h_ref[...] = h.astype(h_ref.dtype)        # cache normed rows for all k steps
        acc_ref[...] = jnp.zeros_like(acc_ref)

    h = h_ref[...]                                 # native dtype into the MXU
    val = jnp.dot(h, wv_ref[...], preferred_element_type=jnp.float32)
    val = val + bv_ref[...].astype(jnp.float32)
    gate = jnp.dot(h, wg_ref[...], preferred_element_type=jnp.float32)
    gate = gate + bg_ref[...].astype(jnp.float32)
    # GEGLU: val * gelu(gate). Exact erf GELU matches F.gelu / nn.GELU defaults.
    hidden = val * jax.nn.gelu(gate, approximate=False)
    acc_ref[...] += jnp.dot(hidden.astype(w2_ref.dtype), w2_ref[...],
                            preferred_element_type=jnp.float32)

    @pl.when(k == pl.num_programs(1) - 1)
    def _():
        out = acc_ref[...] + b2_ref[...].astype(jnp.float32)
        out = out + x_ref[...].astype(jnp.float32)          # residual add fused
        o_ref[...] = out.astype(o_ref.dtype)                # dropout p=0 -> identity


def norm_ff_geglu_residual_pallas(x2d, gamma, beta, params, *, eps=1e-5,
                                  tm=256, tk=256):
    """x + ((LN(x)@Wv+bv) * gelu(LN(x)@Wg+bg)) @ W2 + b2, inner dim streamed."""
    w_val, b_val, w_gate, b_gate, w2, b2 = params
    M, D = x2d.shape
    inner = w_val.shape[1]
    dim_out = w2.shape[1]
    assert dim_out == D, "residual add requires dim_out == dim"

    tm = _pick_row_tile(M, tm, x2d.dtype)
    Mp = _round_up(M, tm)
    xp = _pad_rows(x2d, Mp)

    # Inner-dim tile: multiple of 128 lanes; zero-pad the hidden dim if needed
    # (zero columns give hidden == 0, contributing nothing to the accumulator).
    tk = _round_up(min(tk, _round_up(inner, 128)), 128)
    inner_p = _round_up(inner, tk)
    if inner_p != inner:
        pad = inner_p - inner
        w_val = jnp.pad(w_val, ((0, 0), (0, pad)))
        w_gate = jnp.pad(w_gate, ((0, 0), (0, pad)))
        b_val = jnp.pad(b_val, (0, pad))
        b_gate = jnp.pad(b_gate, (0, pad))
        w2 = jnp.pad(w2, ((0, pad), (0, 0)))
    n_k = inner_p // tk

    g = gamma.reshape(1, D)
    b = beta.reshape(1, D)
    bv = b_val.reshape(1, inner_p)
    bg = b_gate.reshape(1, inner_p)
    b2r = b2.reshape(1, dim_out)

    itemsize = jnp.dtype(x2d.dtype).itemsize
    flops = 2 * M * D * (2 * inner) + 2 * M * inner * dim_out
    bytes_accessed = itemsize * (M * D + 2 * D * inner + 2 * inner
                                 + inner * dim_out + dim_out + M * dim_out)
    cost = pl.CostEstimate(flops=flops, transcendentals=M * inner,
                           bytes_accessed=bytes_accessed)

    out = pl.pallas_call(
        functools.partial(_norm_ff_geglu_res_kernel, eps=eps),
        out_shape=jax.ShapeDtypeStruct((Mp, dim_out), x2d.dtype),
        grid_spec=pltpu.PrefetchScalarGridSpec(
            num_scalar_prefetch=0,
            grid=(Mp // tm, n_k),
            in_specs=[
                pl.BlockSpec((tm, D), lambda i, k: (i, 0)),        # x rows (reused over k)
                pl.BlockSpec((1, D), lambda i, k: (0, 0)),         # gamma
                pl.BlockSpec((1, D), lambda i, k: (0, 0)),         # beta
                pl.BlockSpec((D, tk), lambda i, k: (0, k)),        # W_val tile (streams)
                pl.BlockSpec((1, tk), lambda i, k: (0, k)),        # b_val tile
                pl.BlockSpec((D, tk), lambda i, k: (0, k)),        # W_gate tile (streams)
                pl.BlockSpec((1, tk), lambda i, k: (0, k)),        # b_gate tile
                pl.BlockSpec((tk, dim_out), lambda i, k: (k, 0)),  # W2 tile (streams)
                pl.BlockSpec((1, dim_out), lambda i, k: (0, 0)),   # b2
            ],
            out_specs=pl.BlockSpec((tm, dim_out), lambda i, k: (i, 0)),
            scratch_shapes=[
                pltpu.VMEM((tm, D), x2d.dtype),                    # cached LN(x)
                pltpu.VMEM((tm, dim_out), jnp.float32),            # accumulator
            ],
        ),
        compiler_params=_compiler_params("parallel", "arbitrary"),
        cost_estimate=cost,
    )(xp, g, b, w_val, bv, w_gate, bg, w2, b2r)
    return out[:M]


# ----------------------------- Full block --------------------------------------

def basic_transformer_block_pallas(x, context, params, *, heads, tm=256):
    """BasicTransformerBlock forward, default path (no additional_tokens,
    no skip_attention, no cross-frame repeat, reference_to=None)."""
    B, N, D = x.shape
    Bc, Nc, Dc = context.shape
    M = B * N
    x2 = x.reshape(M, D)
    ctx2 = context.reshape(Bc * Nc, Dc)

    # --- attn1: self-attention on norm1(x) ------------------------------------
    q, k, v = norm_qkv_pallas(x2, params["norm1_g"], params["norm1_b"],
                              params["attn1_wq"], params["attn1_wk"],
                              params["attn1_wv"], tm=tm)
    a = mha_pallas(q.reshape(B, N, -1), k.reshape(B, N, -1), v.reshape(B, N, -1),
                   heads=heads)
    x2 = out_proj_residual_pallas(a.reshape(M, -1), params["attn1_wo"],
                                  params["attn1_bo"], x2, tm=tm)

    # --- attn2: cross-attention on norm2(x), context ---------------------------
    q = norm_linear_pallas(x2, params["norm2_g"], params["norm2_b"],
                           params["attn2_wq"], tm=tm)
    k, v = dual_linear_pallas(ctx2, params["attn2_wk"], params["attn2_wv"], tm=tm)
    a = mha_pallas(q.reshape(B, N, -1), k.reshape(Bc, Nc, -1), v.reshape(Bc, Nc, -1),
                   heads=heads)
    x2 = out_proj_residual_pallas(a.reshape(M, -1), params["attn2_wo"],
                                  params["attn2_bo"], x2, tm=tm)

    # --- ff: GEGLU feed-forward on norm3(x) + residual --------------------------
    x2 = norm_ff_geglu_residual_pallas(
        x2, params["norm3_g"], params["norm3_b"],
        (params["ff_w_val"], params["ff_b_val"],
         params["ff_w_gate"], params["ff_b_gate"],
         params["ff_w2"], params["ff_b2"]), tm=tm)

    return x2.reshape(B, N, D)


def init_block_params(key, dim, n_heads, d_head, context_dim, *, mult=4,
                      dtype=jnp.float32):
    """Synthetic init matching nn.Linear / nn.LayerNorm shapes (weights stored (in, out))."""
    inner = n_heads * d_head
    ff_inner = dim * mult
    keys = iter(jax.random.split(key, 24))

    def lin(kk, d_in, d_out):
        s = 1.0 / (d_in ** 0.5)
        return jax.random.uniform(kk, (d_in, d_out), dtype, -s, s)

    def bias(kk, d_in, d_out):
        s = 1.0 / (d_in ** 0.5)
        return jax.random.uniform(kk, (d_out,), dtype, -s, s)

    p = {}
    p["norm1_g"] = 1.0 + 0.1 * jax.random.normal(next(keys), (dim,), dtype)
    p["norm1_b"] = 0.1 * jax.random.normal(next(keys), (dim,), dtype)
    p["attn1_wq"] = lin(next(keys), dim, inner)
    p["attn1_wk"] = lin(next(keys), dim, inner)
    p["attn1_wv"] = lin(next(keys), dim, inner)
    p["attn1_wo"] = lin(next(keys), inner, dim)
    p["attn1_bo"] = bias(next(keys), inner, dim)

    p["norm2_g"] = 1.0 + 0.1 * jax.random.normal(next(keys), (dim,), dtype)
    p["norm2_b"] = 0.1 * jax.random.normal(next(keys), (dim,), dtype)
    p["attn2_wq"] = lin(next(keys), dim, inner)
    p["attn2_wk"] = lin(next(keys), context_dim, inner)
    p["attn2_wv"] = lin(next(keys), context_dim, inner)
    p["attn2_wo"] = lin(next(keys), inner, dim)
    p["attn2_bo"] = bias(next(keys), inner, dim)

    p["norm3_g"] = 1.0 + 0.1 * jax.random.normal(next(keys), (dim,), dtype)
    p["norm3_b"] = 0.1 * jax.random.normal(next(keys), (dim,), dtype)
    # GEGLU project_in is one Linear(dim, 2*ff_inner); stored split so the kernel
    # uses separate val / gate operands (chunk(2,-1): val = first half, gate = second).
    p["ff_w_val"] = lin(next(keys), dim, ff_inner)
    p["ff_b_val"] = bias(next(keys), dim, ff_inner)
    p["ff_w_gate"] = lin(next(keys), dim, ff_inner)
    p["ff_b_gate"] = bias(next(keys), dim, ff_inner)
    p["ff_w2"] = lin(next(keys), ff_inner, dim)
    p["ff_b2"] = bias(next(keys), ff_inner, dim)
    return p


# ----------------------------- Pure-JAX reference -------------------------------

def _layernorm_ref(x, g, b, eps=1e-5):
    mean = jnp.mean(x, axis=-1, keepdims=True)
    var = jnp.mean((x - mean) ** 2, axis=-1, keepdims=True)
    return (x - mean) * jax.lax.rsqrt(var + eps) * g + b


def _attention_ref(q, k, v, heads):
    B, Nq, inner = q.shape
    Nk = k.shape[1]
    dh = inner // heads
    qh = q.reshape(B, Nq, heads, dh).transpose(0, 2, 1, 3)
    kh = k.reshape(B, Nk, heads, dh).transpose(0, 2, 1, 3)
    vh = v.reshape(B, Nk, heads, dh).transpose(0, 2, 1, 3)
    s = jnp.einsum("bhqd,bhkd->bhqk", qh, kh) * (dh ** -0.5)
    p = jax.nn.softmax(s, axis=-1)
    o = jnp.einsum("bhqk,bhkd->bhqd", p, vh)
    return o.transpose(0, 2, 1, 3).reshape(B, Nq, inner)


def basic_transformer_block_ref(x, context, params, *, heads):
    h = _layernorm_ref(x, params["norm1_g"], params["norm1_b"])
    q, k, v = h @ params["attn1_wq"], h @ params["attn1_wk"], h @ params["attn1_wv"]
    a = _attention_ref(q, k, v, heads)
    x = a @ params["attn1_wo"] + params["attn1_bo"] + x

    h = _layernorm_ref(x, params["norm2_g"], params["norm2_b"])
    q = h @ params["attn2_wq"]
    k, v = context @ params["attn2_wk"], context @ params["attn2_wv"]
    a = _attention_ref(q, k, v, heads)
    x = a @ params["attn2_wo"] + params["attn2_bo"] + x

    h = _layernorm_ref(x, params["norm3_g"], params["norm3_b"])
    val = h @ params["ff_w_val"] + params["ff_b_val"]
    gate = h @ params["ff_w_gate"] + params["ff_b_gate"]
    ff = (val * jax.nn.gelu(gate, approximate=False)) @ params["ff_w2"] + params["ff_b2"]
    return ff + x


# ----------------------------- main ---------------------------------------------

if __name__ == "__main__":
    key = jax.random.PRNGKey(0)
    kx, kc, kp = jax.random.split(key, 3)

    # Small shapes consistent with BasicTransformerBlock:
    #   dim=128, n_heads=4, d_head=32 (inner=128), seq=16,
    #   context: 8 tokens of dim 128, gated_ff=True -> GEGLU, ff inner = 4*dim = 512.
    batch, seq, dim = 2, 16, 128
    n_heads, d_head = 4, 32
    ctx_seq, ctx_dim = 8, 128

    x = jax.random.normal(kx, (batch, seq, dim), jnp.float32)
    context = jax.random.normal(kc, (batch, ctx_seq, ctx_dim), jnp.float32)
    params = init_block_params(kp, dim, n_heads, d_head, ctx_dim, mult=4)

    out = basic_transformer_block_pallas(x, context, params, heads=n_heads)
    jax.block_until_ready(out)
    assert out.shape == (batch, seq, dim)

    ref = basic_transformer_block_ref(x, context, params, heads=n_heads)
    err = float(jnp.max(jnp.abs(out - ref)))
    assert err < 2e-3, f"max abs error too large: {err}"

    print("KERNEL_OK")
</pallas_src>

<mosaic_0001>
module attributes {stable_mosaic.version = 11 : i64} {
  func.func @_norm_qkv_kernel(%arg0: i32, %arg1: memref<32x128xf32, #tpu.memory_space<vmem>>, %arg2: memref<1x128xf32, #tpu.memory_space<vmem>>, %arg3: memref<1x128xf32, #tpu.memory_space<vmem>>, %arg4: memref<128x128xf32, #tpu.memory_space<vmem>>, %arg5: memref<128x128xf32, #tpu.memory_space<vmem>>, %arg6: memref<128x128xf32, #tpu.memory_space<vmem>>, %arg7: memref<32x128xf32, #tpu.memory_space<vmem>>, %arg8: memref<32x128xf32, #tpu.memory_space<vmem>>, %arg9: memref<32x128xf32, #tpu.memory_space<vmem>>) attributes {dimension_semantics = [#tpu.dimension_semantics<parallel>], iteration_bounds = array<i64: 1>, scalar_prefetch = 0 : i64, scratch_operands = 0 : i64, tpu.core_type = #tpu.core_type<tc>, window_params = [{transform_indices = @transform_0, window_bounds = array<i64: 32, 128>}, {pipeline_mode = #tpu.pipeline_mode<synchronous>, transform_indices = @transform_1, window_bounds = array<i64: 1, 128>}, {pipeline_mode = #tpu.pipeline_mode<synchronous>, transform_indices = @transform_2, window_bounds = array<i64: 1, 128>}, {pipeline_mode = #tpu.pipeline_mode<synchronous>, transform_indices = @transform_3, window_bounds = array<i64: 128, 128>}, {pipeline_mode = #tpu.pipeline_mode<synchronous>, transform_indices = @transform_4, window_bounds = array<i64: 128, 128>}, {pipeline_mode = #tpu.pipeline_mode<synchronous>, transform_indices = @transform_5, window_bounds = array<i64: 128, 128>}, {transform_indices = @transform_6, window_bounds = array<i64: 32, 128>}, {transform_indices = @transform_7, window_bounds = array<i64: 32, 128>}, {transform_indices = @transform_8, window_bounds = array<i64: 32, 128>}]} {
    %c0 = arith.constant 0 : index
    %c0_0 = arith.constant 0 : index
    %0 = vector.load %arg1[%c0, %c0_0] : memref<32x128xf32, #tpu.memory_space<vmem>>, vector<32x128xf32>
    %cst = arith.constant dense<0.000000e+00> : vector<32xf32>
    %1 = vector.multi_reduction <add>, %0, %cst [1] : vector<32x128xf32> to vector<32xf32>
    %2 = vector.shape_cast %1 : vector<32xf32> to vector<32x1xf32>
    %cst_1 = arith.constant 1.280000e+02 : f32
    %3 = vector.broadcast %cst_1 : f32 to vector<32x1xf32>
    %4 = arith.divf %2, %3 : vector<32x1xf32>
    %5 = vector.broadcast %4 : vector<32x1xf32> to vector<32x128xf32>
    %6 = arith.subf %0, %5 : vector<32x128xf32>
    %7 = arith.mulf %6, %6 : vector<32x128xf32>
    %cst_2 = arith.constant dense<0.000000e+00> : vector<32xf32>
    %8 = vector.multi_reduction <add>, %7, %cst_2 [1] : vector<32x128xf32> to vector<32xf32>
    %9 = vector.shape_cast %8 : vector<32xf32> to vector<32x1xf32>
    %cst_3 = arith.constant 1.280000e+02 : f32
    %10 = vector.broadcast %cst_3 : f32 to vector<32x1xf32>
    %11 = arith.divf %9, %10 : vector<32x1xf32>
    %cst_4 = arith.constant 9.99999974E-6 : f32
    %12 = vector.broadcast %cst_4 : f32 to vector<32x1xf32>
    %13 = arith.addf %11, %12 : vector<32x1xf32>
    %14 = math.rsqrt %13 : vector<32x1xf32>
    %15 = vector.broadcast %14 : vector<32x1xf32> to vector<32x128xf32>
    %16 = arith.mulf %6, %15 : vector<32x128xf32>
    %c0_5 = arith.constant 0 : index
    %c0_6 = arith.constant 0 : index
    %17 = vector.load %arg2[%c0_5, %c0_6] : memref<1x128xf32, #tpu.memory_space<vmem>>, vector<1x128xf32>
    %18 = vector.broadcast %17 : vector<1x128xf32> to vector<32x128xf32>
    %19 = arith.mulf %16, %18 : vector<32x128xf32>
    %c0_7 = arith.constant 0 : index
    %c0_8 = arith.constant 0 : index
    %20 = vector.load %arg3[%c0_7, %c0_8] : memref<1x128xf32, #tpu.memory_space<vmem>>, vector<1x128xf32>
    %21 = vector.broadcast %20 : vector<1x128xf32> to vector<32x128xf32>
    %22 = arith.addf %19, %21 : vector<32x128xf32>
    %c0_9 = arith.constant 0 : index
    %c0_10 = arith.constant 0 : index
    %23 = vector.load %arg4[%c0_9, %c0_10] : memref<128x128xf32, #tpu.memory_space<vmem>>, vector<128x128xf32>
    %cst_11 = arith.constant dense<0.000000e+00> : vector<32x128xf32>
    %24 = tpu.matmul %22, %23, %cst_11 {dimension_numbers = #tpu.dot_dimension_numbers<[1], [0], [0], [1], [0, 0, 1, 1], [], []>} : vector<32x128xf32>, vector<128x128xf32>, vector<32x128xf32> -> vector<32x128xf32>
    %c0_12 = arith.constant 0 : index
    %c0_13 = arith.constant 0 : index
    %25 = vector.load %arg7[%c0_12, %c0_13] : memref<32x128xf32, #tpu.memory_space<vmem>>, vector<32x128xf32>
    tpu.vector_store %arg7[%c0_12, %c0_13], %24 {strides = array<i32>} : memref<32x128xf32, #tpu.memory_space<vmem>>, vector<32x128xf32>,
    %c0_14 = arith.constant 0 : index
    %c0_15 = arith.constant 0 : index
    %26 = vector.load %arg5[%c0_14, %c0_15] : memref<128x128xf32, #tpu.memory_space<vmem>>, vector<128x128xf32>
    %cst_16 = arith.constant dense<0.000000e+00> : vector<32x128xf32>
    %27 = tpu.matmul %22, %26, %cst_16 {dimension_numbers = #tpu.dot_dimension_numbers<[1], [0], [0], [1], [0, 0, 1, 1], [], []>} : vector<32x128xf32>, vector<128x128xf32>, vector<32x128xf32> -> vector<32x128xf32>
    %c0_17 = arith.constant 0 : index
    %c0_18 = arith.constant 0 : index
    %28 = vector.load %arg8[%c0_17, %c0_18] : memref<32x128xf32, #tpu.memory_space<vmem>>, vector<32x128xf32>
    tpu.vector_store %arg8[%c0_17, %c0_18], %27 {strides = array<i32>} : memref<32x128xf32, #tpu.memory_space<vmem>>, vector<32x128xf32>,
    %c0_19 = arith.constant 0 : index
    %c0_20 = arith.constant 0 : index
    %29 = vector.load %arg6[%c0_19, %c0_20] : memref<128x128xf32, #tpu.memory_space<vmem>>, vector<128x128xf32>
    %cst_21 = arith.constant dense<0.000000e+00> : vector<32x128xf32>
    %30 = tpu.matmul %22, %29, %cst_21 {dimension_numbers = #tpu.dot_dimension_numbers<[1], [0], [0], [1], [0, 0, 1, 1], [], []>} : vector<32x128xf32>, vector<128x128xf32>, vector<32x128xf32> -> vector<32x128xf32>
    %c0_22 = arith.constant 0 : index
    %c0_23 = arith.constant 0 : index
    %31 = vector.load %arg9[%c0_22, %c0_23] : memref<32x128xf32, #tpu.memory_space<vmem>>, vector<32x128xf32>
    tpu.vector_store %arg9[%c0_22, %c0_23], %30 {strides = array<i32>} : memref<32x128xf32, #tpu.memory_space<vmem>>, vector<32x128xf32>,
    return
  }
  func.func @transform_0(%arg0: i32) -> (i32, i32) {
    %c0_i32 = arith.constant 0 : i32
    %c0_i32_0 = arith.constant 0 : i32
    return %arg0, %c0_i32 : i32, i32
  }
  func.func @transform_1(%arg0: i32) -> (i32, i32) {
    %c0_i32 = arith.constant 0 : i32
    %c0_i32_0 = arith.constant 0 : i32
    %c0_i32_1 = arith.constant 0 : i32
    return %c0_i32, %c0_i32_0 : i32, i32
  }
  func.func @transform_2(%arg0: i32) -> (i32, i32) {
    %c0_i32 = arith.constant 0 : i32
    %c0_i32_0 = arith.constant 0 : i32
    %c0_i32_1 = arith.constant 0 : i32
    return %c0_i32, %c0_i32_0 : i32, i32
  }
  func.func @transform_3(%arg0: i32) -> (i32, i32) {
    %c0_i32 = arith.constant 0 : i32
    %c0_i32_0 = arith.constant 0 : i32
    %c0_i32_1 = arith.constant 0 : i32
    return %c0_i32, %c0_i32_0 : i32, i32
  }
  func.func @transform_4(%arg0: i32) -> (i32, i32) {
    %c0_i32 = arith.constant 0 : i32
    %c0_i32_0 = arith.constant 0 : i32
    %c0_i32_1 = arith.constant 0 : i32
    return %c0_i32, %c0_i32_0 : i32, i32
  }
  func.func @transform_5(%arg0: i32) -> (i32, i32) {
    %c0_i32 = arith.constant 0 : i32
    %c0_i32_0 = arith.constant 0 : i32
    %c0_i32_1 = arith.constant 0 : i32
    return %c0_i32, %c0_i32_0 : i32, i32
  }
  func.func @transform_6(%arg0: i32) -> (i32, i32) {
    %c0_i32 = arith.constant 0 : i32
    %c0_i32_0 = arith.constant 0 : i32
    return %arg0, %c0_i32 : i32, i32
  }
  func.func @transform_7(%arg0: i32) -> (i32, i32) {
    %c0_i32 = arith.constant 0 : i32
    %c0_i32_0 = arith.constant 0 : i32
    return %arg0, %c0_i32 : i32, i32
  }
  func.func @transform_8(%arg0: i32) -> (i32, i32) {
    %c0_i32 = arith.constant 0 : i32
    %c0_i32_0 = arith.constant 0 : i32
    return %arg0, %c0_i32 : i32, i32
  }
}

</mosaic_0001>

<bundles_post_ra>
// kernel: tpu_custom_call.1
= control target key start
LH: loop header
LB: loop body
LE: loop exit
PB: predicated region body
PF: predicated region fallthrough
CT: control target
= control target key end

     0   :  { %14 = vsyncpa [#allocation3], 0  ;;  %s1194_s0 = inlined_call_operand.hbm [shape: f32[32,128], index: 0, kind: input, shape index: {}]   ;;  %s1195_s1 = inlined_call_operand.vmem [shape: f32[1,128], index: 1, kind: input, shape index: {}]   ;;  %s1196_s2 = inlined_call_operand.vmem [shape: f32[1,128], index: 2, kind: input, shape index: {}]   ;;  %s1197_s3 = inlined_call_operand.hbm [shape: f32[128,128], index: 3, kind: input, shape index: {}]   ;;  %s1198_s4 = inlined_call_operand.hbm [shape: f32[128,128], index: 4, kind: input, shape index: {}]   ;;  %s1199_s5 = inlined_call_operand.hbm [shape: f32[128,128], index: 5, kind: input, shape index: {}]   ;;  %s1200_s6 = inlined_call_operand.hbm [shape: f32[32,128], index: 6, kind: output, shape index: {0}]   ;;  %s1201_s7 = inlined_call_operand.hbm [shape: f32[32,128], index: 7, kind: output, shape index: {1}]   ;;  %s1202_s8 = inlined_call_operand.hbm [shape: f32[32,128], index: 8, kind: output, shape index: {2}]  }
   0x1   :  { %15 = vsyncpa [#allocation6], 0 }
   0x2   :  { %16 = vsyncpa [#allocation9], 0 }
   0x3   :  { %17 = vsyncpa [#allocation4], 0 }
   0x4   :  { %18 = vsyncpa [#allocation12], 0  ;;  %s988_s27 = smov [#allocation5]   ;;  %s989_s29 = smov [#allocation2]  }
   0x5   :  { %s40_s28 = sshll.u32 %s988_s27, 4  ;;  %s24_s30 = sshll.u32 %s989_s29, 4  ;;  %s41_s28 = int_to_ptr.vmem [resolvable:$true] %s40_s28  ;;  %s1042_s30 = int_to_ptr.vmem [resolvable:$true] %s24_s30 }
   0x6   :  { %s824_s11 = scalar_lea.hbm %s1197_s3, 2048 }
   0x7   :  { %p825_p0 = scmp.ne.s32.totalorder %s1197_s3, %s824_s11  ;;  %p828_p1 = scmp.lt.u32.totalorder %s824_s11, %s1197_s3 }
   0x9   :  { %p830_p2 = pnand %p828_p1, %p825_p0 }
   0xb   :  { %833 = shalt.err (!%p830_p2)
}
   0xc   :  { %s834_s16 = scalar_lea.vmem %s41_s28, 2048  ;;  %p839_p4 = scmp.lt.s32.totalorder %s41_s28, %s41_s28 }
   0xd   :  { %p835_p3 = scmp.ne.s32.totalorder %s41_s28, %s834_s16  ;;  %p840_p5 = scmp.lt.s32.totalorder %s834_s16, %s834_s16 }
   0xf   :  { %p841_p6 = por %p840_p5, %p839_p4 }
  0x11   :  { %p842_p7 = pnand %p841_p6, %p835_p3 }
  0x13   :  { %845 = shalt.err (!%p842_p7)
}
  0x14   :  { %s990_s17 = smov 128   ;;  %s991_s18 = smov 8  }
  0x15   :  { %46 = dma.hbm_to_vmem [thread:$0]  %s1197_s3, 2048, %s41_s28, [#allocation6], %s990_s17, %s990_s17, %s991_s18  }
  0x16   :  { %s846_s23 = scalar_lea.hbm %s1194_s0, 512 }
  0x17   :  { %p847_p8 = scmp.ne.s32.totalorder %s1194_s0, %s846_s23  ;;  %p850_p9 = scmp.lt.u32.totalorder %s846_s23, %s1194_s0 }
  0x19   :  { %p852_p10 = pnand %p850_p9, %p847_p8 }
  0x1b   :  { %855 = shalt.err (!%p852_p10)
}
  0x1c   :  { %s856_s29 = scalar_lea.vmem %s1042_s30, 512  ;;  %p861_p12 = scmp.lt.s32.totalorder %s1042_s30, %s1042_s30 }
  0x1d   :  { %p857_p11 = scmp.ne.s32.totalorder %s1042_s30, %s856_s29  ;;  %p862_p13 = scmp.lt.s32.totalorder %s856_s29, %s856_s29 }
  0x1f   :  { %p863_p0 = por %p862_p13, %p861_p12 }
  0x21   :  { %p864_p1 = pnand %p863_p0, %p857_p11 }
  0x23   :  { %867 = shalt.err (!%p864_p1)
}
  0x24   :  { %30 = dma.hbm_to_vmem [thread:$0]  %s1194_s0, 512, %s1042_s30, [#allocation3], %s990_s17, %s990_s17, %s991_s18  }
  0x25   :  { %s992_s9 = smov [#allocation7]   ;;  %s993_s11 = smov [#allocation8]  }
  0x26   :  { %s52_s10 = sshll.u32 %s992_s9, 4  ;;  %s64_s12 = sshll.u32 %s993_s11, 4  ;;  %s53_s10 = int_to_ptr.vmem [resolvable:$true] %s52_s10  ;;  %s1079_s12 = int_to_ptr.vmem [resolvable:$true] %s64_s12 }
  0x27   :  { %s868_s15 = scalar_lea.hbm %s1198_s4, 2048 }
  0x28   :  { %p869_p2 = scmp.ne.s32.totalorder %s1198_s4, %s868_s15  ;;  %p872_p3 = scmp.lt.u32.totalorder %s868_s15, %s1198_s4 }
  0x2a   :  { %p874_p4 = pnand %p872_p3, %p869_p2 }
  0x2c   :  { %877 = shalt.err (!%p874_p4)
}
  0x2d   :  { %s878_s0 = scalar_lea.vmem %s53_s10, 2048  ;;  %p883_p6 = scmp.lt.s32.totalorder %s53_s10, %s53_s10 }
  0x2e   :  { %p879_p5 = scmp.ne.s32.totalorder %s53_s10, %s878_s0  ;;  %p884_p7 = scmp.lt.s32.totalorder %s878_s0, %s878_s0 }
  0x30   :  { %p885_p8 = por %p884_p7, %p883_p6 }
  0x32   :  { %p886_p9 = pnand %p885_p8, %p879_p5 }
  0x34   :  { %889 = shalt.err (!%p886_p9)
}
  0x35   :  { %58 = dma.hbm_to_vmem [thread:$0]  %s1198_s4, 2048, %s53_s10, [#allocation6], %s990_s17, %s990_s17, %s991_s18  }
  0x36   :  { %s890_s25 = scalar_lea.hbm %s1199_s5, 2048 }
  0x37   :  { %p891_p10 = scmp.ne.s32.totalorder %s1199_s5, %s890_s25  ;;  %p894_p11 = scmp.lt.u32.totalorder %s890_s25, %s1199_s5 }
  0x39   :  { %p896_p12 = pnand %p894_p11, %p891_p10 }
  0x3b   :  { %899 = shalt.err (!%p896_p12)
}
  0x3c   :  { %s900_s28 = scalar_lea.vmem %s1079_s12, 2048  ;;  %p905_p0 = scmp.lt.s32.totalorder %s1079_s12, %s1079_s12 }
  0x3d   :  { %p901_p13 = scmp.ne.s32.totalorder %s1079_s12, %s900_s28  ;;  %p906_p1 = scmp.lt.s32.totalorder %s900_s28, %s900_s28 }
  0x3f   :  { %p907_p2 = por %p906_p1, %p905_p0 }
  0x41   :  { %p908_p3 = pnand %p907_p2, %p901_p13 }
  0x43   :  { %911 = shalt.err (!%p908_p3)
}
  0x44   :  { %70 = dma.hbm_to_vmem [thread:$0]  %s1199_s5, 2048, %s1079_s12, [#allocation9], %s990_s17, %s990_s17, %s991_s18  }
  0x45   :  { %978 = dma.done.wait [#allocation3], 512  }
  0x46   :  { %979 = vsyncadd [#allocation3], 4294966784 }
  0x47   :  { %980 = dma.done.wait [#allocation6], 4096  }
  0x48   :  { %981 = vsyncadd [#allocation6], 4294963200 }
  0x49   :  { %982 = dma.done.wait [#allocation9], 2048  }
  0x4a   :  { %983 = vsyncadd [#allocation9], 4294965248  ;;  %v83_v0 = vld [vmem:[#allocation2] sm:$0xff]  ;;  %v85_v1 = vld [vmem:[#allocation2 + $0x10] sm:$0xff]  ;;  %s995_s13 = smov [#allocation10]  }
  0x4b   :  { %87 = vadd.xlane.f32.xlu0 %v83_v0  ;;  %91 = vadd.xlane.f32.xlu1 %v85_v1  ;;  %v84_v2 = vld [vmem:[#allocation2 + $0x8] sm:$0xff]  ;;  %v86_v3 = vld [vmem:[#allocation2 + $0x18] sm:$0xff]  ;;  %v154_v4 = vld [vmem:[#allocation5] sm:$0xff]  ;;  %s474_s14 = sshll.u32 %s995_s13, 4  ;;  %s1142_s14 = int_to_ptr.vmem [resolvable:$true] %s474_s14 }
  0x4c   :  { %v155_v5 = vld [vmem:[#allocation5 + $0x8] sm:$0xff]  ;;  %v259_v6 = vld [vmem:[#allocation7] sm:$0xff]  ;;  %v156_v9 = vld [vmem:[#allocation5 + $0x10] sm:$0xff] }
  0x4d   :  { %v695_v7 = vpack.c.bf16 %v155_v5, %v154_v4  ;;  %v260_v8 = vld [vmem:[#allocation7 + $0x8] sm:$0xff]  ;;  %v157_v10 = vld [vmem:[#allocation5 + $0x18] sm:$0xff]  ;;  %v261_v13 = vld [vmem:[#allocation7 + $0x10] sm:$0xff] }
  0x4e   :  { %v727_v11 = vpack.c.bf16 %v260_v8, %v259_v6  ;;  %v699_v12 = vpack.c.bf16 %v157_v10, %v156_v9  ;;  %v262_v14 = vld [vmem:[#allocation7 + $0x18] sm:$0xff]  ;;  %v158_v32 = vld [vmem:[#allocation5 + $0x20] sm:$0xff]  ;;  %v159_v33 = vld [vmem:[#allocation5 + $0x28] sm:$0xff] }
  0x4f   :  { %89 = vadd.xlane.f32.xlu0 %v84_v2  ;;  %93 = vadd.xlane.f32.xlu1 %v86_v3  ;;  %v731_v15 = vpack.c.bf16 %v262_v14, %v261_v13  ;;  %v263_v34 = vld [vmem:[#allocation7 + $0x20] sm:$0xff]  ;;  %v703_v35 = vpack.c.bf16 %v159_v33, %v158_v32  ;;  %v264_v36 = vld [vmem:[#allocation7 + $0x28] sm:$0xff]  ;;  %v160_v38 = vld [vmem:[#allocation5 + $0x30] sm:$0xff] }
  0x50   :  { %696 = vmatprep.subr.bf16.mxu0 %v695_v7  ;;  %728 = vmatprep.subr.bf16.mxu1 %v727_v11  ;;  %v735_v37 = vpack.c.bf16 %v264_v36, %v263_v34  ;;  %v161_v39 = vld [vmem:[#allocation5 + $0x38] sm:$0xff]  ;;  %v265_v40 = vld [vmem:[#allocation7 + $0x30] sm:$0xff]  ;;  %v162_v44 = vld [vmem:[#allocation5 + $0x40] sm:$0xff] }
  0x51   :  { %698 = vmatpush3.bf16.msra.mxu0 %v695_v7  ;;  %730 = vmatpush3.bf16.msra.mxu1 %v727_v11  ;;  %v707_v41 = vpack.c.bf16 %v161_v39, %v160_v38  ;;  %v266_v42 = vld [vmem:[#allocation7 + $0x38] sm:$0xff]  ;;  %v163_v45 = vld [vmem:[#allocation5 + $0x48] sm:$0xff]  ;;  %v267_v46 = vld [vmem:[#allocation7 + $0x40] sm:$0xff] }
  0x52   :  { %700 = vmatprep.subr.bf16.mxu0 %v699_v12  ;;  %732 = vmatprep.subr.bf16.mxu1 %v731_v15  ;;  %v739_v43 = vpack.c.bf16 %v266_v42, %v265_v40  ;;  %v711_v47 = vpack.c.bf16 %v163_v45, %v162_v44  ;;  %v268_v48 = vld [vmem:[#allocation7 + $0x48] sm:$0xff]  ;;  %v164_v50 = vld [vmem:[#allocation5 + $0x50] sm:$0xff]  ;;  %v165_v51 = vld [vmem:[#allocation5 + $0x58] sm:$0xff] }
  0x53   :  { %v743_v49 = vpack.c.bf16 %v268_v48, %v267_v46  ;;  %v269_v52 = vld [vmem:[#allocation7 + $0x50] sm:$0xff]  ;;  %v715_v53 = vpack.c.bf16 %v165_v51, %v164_v50  ;;  %v270_v54 = vld [vmem:[#allocation7 + $0x58] sm:$0xff]  ;;  %v166_v56 = vld [vmem:[#allocation5 + $0x60] sm:$0xff] }
  0x54   :  { %v747_v55 = vpack.c.bf16 %v270_v54, %v269_v52  ;;  %v167_v57 = vld [vmem:[#allocation5 + $0x68] sm:$0xff]  ;;  %v271_v58 = vld [vmem:[#allocation7 + $0x60] sm:$0xff]  ;;  %v168_v61 = vld [vmem:[#allocation5 + $0x70] sm:$0xff] }
  0x55   :  { %702 = vmatpush3.bf16.msra.mxu0 %v699_v12  ;;  %734 = vmatpush3.bf16.msra.mxu1 %v731_v15  ;;  %v719_v59 = vpack.c.bf16 %v167_v57, %v166_v56  ;;  %v272_v60 = vld [vmem:[#allocation7 + $0x68] sm:$0xff]  ;;  %v169_v62 = vld [vmem:[#allocation5 + $0x78] sm:$0xff]  ;;  %v364_v4 = vld [vmem:[#allocation8] sm:$0xff] }
  0x56   :  { %704 = vmatprep.subr.bf16.mxu0 %v703_v35  ;;  %736 = vmatprep.subr.bf16.mxu1 %v735_v37  ;;  %v751_v63 = vpack.c.bf16 %v272_v60, %v271_v58  ;;  %v365_v5 = vld [vmem:[#allocation8 + $0x8] sm:$0xff]  ;;  %v366_v34 = vld [vmem:[#allocation8 + $0x10] sm:$0xff]  ;;  %v368_v42 = vld [vmem:[#allocation8 + $0x20] sm:$0xff] }
  0x57   :  { %v759_v6 = vpack.c.bf16 %v365_v5, %v364_v4  ;;  %v370_v44 = vld [vmem:[#allocation8 + $0x30] sm:$0xff]  ;;  %v371_v45 = vld [vmem:[#allocation8 + $0x38] sm:$0xff]  ;;  %v372_v46 = vld [vmem:[#allocation8 + $0x40] sm:$0xff] }
  0x58   :  { %v375_v50 = vld [vmem:[#allocation8 + $0x58] sm:$0xff]  ;;  %v376_v52 = vld [vmem:[#allocation8 + $0x60] sm:$0xff] }
  0x59   :  { %706 = vmatpush3.bf16.msra.mxu0 %v703_v35  ;;  %738 = vmatpush3.bf16.msra.mxu1 %v735_v37  ;;  %v367_v35 = vld [vmem:[#allocation8 + $0x18] sm:$0xff] }
  0x5a   :  { %708 = vmatprep.subr.bf16.mxu0 %v707_v41  ;;  %740 = vmatprep.subr.bf16.mxu1 %v739_v43  ;;  %v763_v40 = vpack.c.bf16 %v367_v35, %v366_v34  ;;  %v379_v56 = vld [vmem:[#allocation8 + $0x78] sm:$0xff] }
  0x5d   :  { %710 = vmatpush3.bf16.msra.mxu0 %v707_v41  ;;  %742 = vmatpush3.bf16.msra.mxu1 %v739_v43  ;;  %v369_v43 = vld [vmem:[#allocation8 + $0x28] sm:$0xff] }
  0x5e   :  { %712 = vmatprep.subr.bf16.mxu0 %v711_v47  ;;  %744 = vmatprep.subr.bf16.mxu1 %v743_v49 }
  0x61   :  { %714 = vmatpush3.bf16.msra.mxu0 %v711_v47  ;;  %746 = vmatpush3.bf16.msra.mxu1 %v743_v49  ;;  %v373_v47 = vld [vmem:[#allocation8 + $0x48] sm:$0xff]  ;;  %v374_v49 = vld [vmem:[#allocation8 + $0x50] sm:$0xff] }
  0x62   :  { %716 = vmatprep.subr.bf16.mxu0 %v715_v53  ;;  %748 = vmatprep.subr.bf16.mxu1 %v747_v55  ;;  %v775_v48 = vpack.c.bf16 %v373_v47, %v372_v46  ;;  %v779_v51 = vpack.c.bf16 %v375_v50, %v374_v49 }
  0x65   :  { %718 = vmatpush3.bf16.msra.mxu0 %v715_v53  ;;  %750 = vmatpush3.bf16.msra.mxu1 %v747_v55  ;;  %v377_v53 = vld [vmem:[#allocation8 + $0x68] sm:$0xff]  ;;  %v378_v55 = vld [vmem:[#allocation8 + $0x70] sm:$0xff] }
  0x66   :  { %720 = vmatprep.subr.bf16.mxu0 %v719_v59  ;;  %752 = vmatprep.subr.bf16.mxu1 %v751_v63  ;;  %v783_v54 = vpack.c.bf16 %v377_v53, %v376_v52  ;;  %v787_v57 = vpack.c.bf16 %v379_v56, %v378_v55 }
  0x69   :  { %722 = vmatpush3.bf16.msra.mxu0 %v719_v59  ;;  %754 = vmatpush3.bf16.msra.mxu1 %v751_v63 }
  0xd8   :  { %v88_v16 = vpop.xlane.xlu0 %87  ;;  %v92_v17 = vpop.xlane.xlu1 %91 }
  0xd9   :  { %v96_v18 = vmul.f32 0.0078125, %v88_v16  ;;  %v98_v19 = vmul.f32 0.0078125, %v92_v17 }
  0xdb   :  { %v1116_v20 = vsub.f32 %v83_v0, %v96_v18  ;;  %v1118_v21 = vsub.f32 %v85_v1, %v98_v19  ;;  %v273_v0 = vld [vmem:[#allocation7 + $0x70] sm:$0xff]  ;;  %v274_v1 = vld [vmem:[#allocation7 + $0x78] sm:$0xff] }
  0xdc   :  { %v90_v22 = vpop.xlane.xlu0 %89  ;;  %v94_v23 = vpop.xlane.xlu1 %93 }
  0xdd   :  { %v97_v24 = vmul.f32 0.0078125, %v90_v22  ;;  %v104_v25 = vmul.f32 %v1116_v20, %v1116_v20  ;;  %v99_v26 = vmul.f32 0.0078125, %v94_v23  ;;  %v106_v29 = vmul.f32 %v1118_v21, %v1118_v21  ;;  %v519_v22 = vld [vmem:[%s1195_s1] ss:$0 sm:$0xff]  ;;  %s994_s1 = smov [#allocation11]  }
  0xdf   :  { %v1122_v27 = vsub.f32 %v84_v2, %v97_v24  ;;  %108 = vadd.xlane.f32.xlu0 %v104_v25  ;;  %v1124_v28 = vsub.f32 %v86_v3, %v99_v26  ;;  %v723_v2 = vpack.c.bf16 %v169_v62, %v168_v61  ;;  %v755_v3 = vpack.c.bf16 %v274_v1, %v273_v0  ;;  %v520_v24 = vld [vmem:[%s1196_s2] ss:$0 sm:$0xff]  ;;  %s486_s2 = sshll.u32 %s994_s1, 4  ;;  %s487_s2 = int_to_ptr.vmem [resolvable:$true] %s486_s2 }
  0xe0   :  { %s912_s15 = scalar_lea.vmem %s487_s2, 512  ;;  %p917_p5 = scmp.lt.s32.totalorder %s487_s2, %s487_s2 }
  0xe1   :  { %v105_v30 = vmul.f32 %v1122_v27, %v1122_v27  ;;  %v107_v31 = vmul.f32 %v1124_v28, %v1124_v28  ;;  %724 = vmatprep.subr.bf16.mxu0 %v723_v2  ;;  %756 = vmatprep.subr.bf16.mxu1 %v755_v3  ;;  %p913_p4 = scmp.ne.s32.totalorder %s487_s2, %s912_s15  ;;  %p918_p6 = scmp.lt.s32.totalorder %s912_s15, %s912_s15 }
  0xe2   :  { %726 = vmatpush3.bf16.msra.mxu0 %v723_v2  ;;  %758 = vmatpush3.bf16.msra.mxu1 %v755_v3 }
  0xe3   :  { %112 = vadd.xlane.f32.xlu0 %v106_v29  ;;  %110 = vadd.xlane.f32.xlu1 %v105_v30  ;;  %p919_p7 = por %p918_p6, %p917_p5 }
  0xe4   :  { %760 = vmatprep.subr.bf16.mxu0 %v759_v6  ;;  %791 = vmatprep.subr.bf16.mxu1 %v759_v6 }
  0xe5   :  { %p920_p8 = pnand %p919_p7, %p913_p4 }
  0xe7   :  { %114 = vadd.xlane.f32.xlu1 %v107_v31 }
 0x16c   :  { %v109_v7 = vpop.xlane.xlu0 %108 }
 0x16d   :  { %v116_v8 = vmul.f32 0.0078125, %v109_v7 }
 0x16f   :  { %v120_v9 = vadd.f32 1e-05, %v116_v8 }
 0x170   :  { %v111_v10 = vpop.xlane.xlu1 %110  ;;  %v113_v11 = vpop.xlane.xlu0 %112 }
 0x171   :  { %816 = vrsqrt.f32 %v120_v9  ;;  %v117_v12 = vmul.f32 0.0078125, %v111_v10  ;;  %v118_v13 = vmul.f32 0.0078125, %v113_v11 }
 0x173   :  { %v121_v14 = vadd.f32 1e-05, %v117_v12  ;;  %v122_v15 = vadd.f32 1e-05, %v118_v13 }
 0x174   :  { %v115_v16 = vpop.xlane.xlu1 %114 }
 0x175   :  { %818 = vrsqrt.f32 %v121_v14  ;;  %v119_v17 = vmul.f32 0.0078125, %v115_v16 }
 0x176   :  { %820 = vrsqrt.f32 %v122_v15 }
 0x177   :  { %v123_v18 = vadd.f32 1e-05, %v119_v17 }
 0x179   :  { %822 = vrsqrt.f32 %v123_v18 }
 0x17b   :  { %v817_v19 = vpop.eup %816 }
 0x17c   :  { %v128_v23 = vmul.f32 %v817_v19, %v1116_v20 }
 0x17e   :  { %v139_v25 = vmul.f32 %v519_v22, %v128_v23 }
 0x17f   :  { %v819_v26 = vpop.eup %818 }
 0x180   :  { %v821_v29 = vpop.eup %820  ;;  %v150_v30 = vadd.f32 %v520_v24, %v139_v25  ;;  %v129_v31 = vmul.f32 %v819_v26, %v1122_v27  ;;  %v767_v27 = vpack.c.bf16 %v369_v43, %v368_v42 }
 0x181   :  { %v130_v32 = vmul.f32 %v821_v29, %v1118_v21 }
 0x182   :  { %613 = vmatprep.mubr.f32.mxu0 %v150_v30  ;;  %651 = vmatprep.mubr.f32.mxu1 %v150_v30  ;;  %v140_v33 = vmul.f32 %v519_v22, %v129_v31 }
 0x183   :  { %v823_v36 = vpop.eup %822  ;;  %v141_v37 = vmul.f32 %v519_v22, %v130_v32 }
 0x184   :  { %v151_v20 = vadd.f32 %v520_v24, %v140_v33  ;;  %v131_v38 = vmul.f32 %v823_v36, %v1124_v28  ;;  %v771_v28 = vpack.c.bf16 %v371_v45, %v370_v44 }
 0x185   :  { %v152_v39 = vadd.f32 %v520_v24, %v141_v37 }
 0x186   :  { %614 = vmatmul.mubr.f32.vlgmr.msra.gmra.mrb[0].mxu0 %v151_v20  ;;  %652 = vmatmul.mubr.f32.vlgmr.msra.gmra.mrb[0].mxu1 %v151_v20  ;;  %v142_v41 = vmul.f32 %v519_v22, %v131_v38 }
 0x187   :  { %762 = vmatpush3.bf16.msra.mxu0 %v759_v6  ;;  %799 = vmatpush3.bf16.msra.mxu1 %v759_v6 }
 0x188   :  { %616 = vmatprep.mubr.f32.mxu0 %v152_v39  ;;  %654 = vmatprep.mubr.f32.mxu1 %v152_v39  ;;  %v153_v21 = vadd.f32 %v520_v24, %v142_v41 }
 0x189   :  { %764 = vmatprep.subr.bf16.mxu0 %v763_v40  ;;  %792 = vmatprep.subr.bf16.mxu1 %v763_v40 }
 0x18a   :  { %617 = vmatmul.mubr.f32.gmra.mrb[2].mxu0 %v153_v21  ;;  %655 = vmatmul.mubr.f32.gmra.mrb[2].mxu1 %v153_v21 }
 0x18b   :  { %766 = vmatpush3.bf16.msra.mxu0 %v763_v40  ;;  %800 = vmatpush3.bf16.msra.mxu1 %v763_v40 }
 0x18c   :  { %689 = vmatprep.mubr.f32.mxu0 %v150_v30  ;;  %692 = vmatprep.mubr.f32.mxu1 %v152_v39 }
 0x18d   :  { %768 = vmatprep.subr.bf16.mxu0 %v767_v27  ;;  %793 = vmatprep.subr.bf16.mxu1 %v767_v27 }
 0x18f   :  { %770 = vmatpush3.bf16.msra.mxu0 %v767_v27  ;;  %801 = vmatpush3.bf16.msra.mxu1 %v767_v27 }
 0x190   :  { %772 = vmatprep.subr.bf16.mxu0 %v771_v28  ;;  %794 = vmatprep.subr.bf16.mxu1 %v771_v28 }
 0x193   :  { %774 = vmatpush3.bf16.msra.mxu0 %v771_v28  ;;  %802 = vmatpush3.bf16.msra.mxu1 %v771_v28 }
 0x194   :  { %776 = vmatprep.subr.bf16.mxu0 %v775_v48  ;;  %795 = vmatprep.subr.bf16.mxu1 %v775_v48 }
 0x197   :  { %778 = vmatpush3.bf16.msra.mxu0 %v775_v48  ;;  %803 = vmatpush3.bf16.msra.mxu1 %v775_v48 }
 0x198   :  { %780 = vmatprep.subr.bf16.mxu0 %v779_v51  ;;  %796 = vmatprep.subr.bf16.mxu1 %v779_v51 }
 0x19b   :  { %782 = vmatpush3.bf16.msra.mxu0 %v779_v51  ;;  %804 = vmatpush3.bf16.msra.mxu1 %v779_v51 }
 0x19c   :  { %784 = vmatprep.subr.bf16.mxu0 %v783_v54  ;;  %797 = vmatprep.subr.bf16.mxu1 %v783_v54 }
 0x19f   :  { %786 = vmatpush3.bf16.msra.mxu0 %v783_v54  ;;  %805 = vmatpush3.bf16.msra.mxu1 %v783_v54 }
 0x1a0   :  { %788 = vmatprep.subr.bf16.mxu0 %v787_v57  ;;  %798 = vmatprep.subr.bf16.mxu1 %v787_v57 }
 0x1a3   :  { %790 = vmatpush3.bf16.msra.mxu0 %v787_v57  ;;  %806 = vmatpush3.bf16.msra.mxu1 %v787_v57 }
 0x1a6   :  { %690 = vmatmul.mubr.f32.vlgmr.msra.gmra.mrb[4].mxu0 %v151_v20  ;;  %693 = vmatmul.mubr.f32.vlgmr.msra.gmra.mrb[4].mxu1 %v153_v21 }
 0x259   :  { %v615_v58 = vpop.f32.mrb[0].mxu0  ;;  %v653_v59 = vpop.f32.mrb[0].mxu1 }
 0x25a   :  { %256 = vst [vmem:[#allocation10 + $0x8] sm:$0xff] %v615_v58  ;;  %361 = vst [vmem:[#allocation11 + $0x8] sm:$0xff] %v653_v59  ;;  %v236_v60 = vpop.f32.mrb[1].mxu0  ;;  %v341_v61 = vpop.f32.mrb[1].mxu1 }
 0x25b   :  { %255 = vst [vmem:[#allocation10] sm:$0xff] %v236_v60  ;;  %360 = vst [vmem:[#allocation11] sm:$0xff] %v341_v61 }
 0x25d   :  { %v618_v62 = vpop.f32.mrb[2].mxu0  ;;  %v656_v63 = vpop.f32.mrb[2].mxu1 }
 0x25e   :  { %258 = vst [vmem:[#allocation10 + $0x18] sm:$0xff] %v618_v62  ;;  %363 = vst [vmem:[#allocation11 + $0x18] sm:$0xff] %v656_v63  ;;  %v246_v0 = vpop.f32.mrb[3].mxu0  ;;  %v351_v1 = vpop.f32.mrb[3].mxu1 }
 0x25f   :  { %257 = vst [vmem:[#allocation10 + $0x10] sm:$0xff] %v246_v0  ;;  %362 = vst [vmem:[#allocation11 + $0x10] sm:$0xff] %v351_v1 }
 0x260   :  { %923 = shalt.err (!%p920_p8)
}
 0x261   :  { %s924_s20 = scalar_lea.hbm %s1201_s7, 512 }
 0x262   :  { %p925_p9 = scmp.ne.s32.totalorder %s1201_s7, %s924_s20  ;;  %p928_p10 = scmp.lt.u32.totalorder %s924_s20, %s1201_s7 }
 0x264   :  { %p930_p11 = pnand %p928_p10, %p925_p9 }
 0x266   :  { %933 = shalt.err (!%p930_p11)
}
 0x267   :  { %492 = dma.vmem_to_hbm [thread:$0]  %s487_s2, 512, %s1201_s7, [#allocation12], %s990_s17, %s990_s17, %s991_s18  }
 0x268   :  { %s934_s25 = scalar_lea.vmem %s1142_s14, 512  ;;  %p939_p13 = scmp.lt.s32.totalorder %s1142_s14, %s1142_s14 }
 0x269   :  { %p935_p12 = scmp.ne.s32.totalorder %s1142_s14, %s934_s25  ;;  %p940_p0 = scmp.lt.s32.totalorder %s934_s25, %s934_s25 }
 0x26b   :  { %p941_p1 = por %p940_p0, %p939_p13 }
 0x26d   :  { %p942_p2 = pnand %p941_p1, %p935_p12 }
 0x26f   :  { %945 = shalt.err (!%p942_p2)
}
 0x270   :  { %s946_s29 = scalar_lea.hbm %s1200_s6, 512 }
 0x271   :  { %p947_p3 = scmp.ne.s32.totalorder %s1200_s6, %s946_s29  ;;  %p950_p4 = scmp.lt.u32.totalorder %s946_s29, %s1200_s6 }
 0x273   :  { %p952_p5 = pnand %p950_p4, %p947_p3 }
 0x275   :  { %955 = shalt.err (!%p952_p5)
}
 0x276   :  { %480 = dma.vmem_to_hbm [thread:$0]  %s1142_s14, 512, %s1200_s6, [#allocation4], %s990_s17, %s990_s17, %s991_s18  }
 0x277   :  { %s996_s10 = smov [#allocation13]  }
 0x278   :  { %s498_s11 = sshll.u32 %s996_s10, 4  ;;  %s499_s11 = int_to_ptr.vmem [resolvable:$true] %s498_s11 }
 0x279   :  { %v691_v2 = vpop.f32.mrb[4].mxu0  ;;  %v694_v3 = vpop.f32.mrb[4].mxu1  ;;  %s956_s12 = scalar_lea.vmem %s499_s11, 512  ;;  %p961_p7 = scmp.lt.s32.totalorder %s499_s11, %s499_s11 }
 0x27a   :  { %466 = vst [vmem:[#allocation13 + $0x8] sm:$0xff] %v691_v2  ;;  %468 = vst [vmem:[#allocation13 + $0x18] sm:$0xff] %v694_v3  ;;  %v446_v4 = vpop.f32.mrb[5].mxu0  ;;  %v456_v5 = vpop.f32.mrb[5].mxu1  ;;  %p957_p6 = scmp.ne.s32.totalorder %s499_s11, %s956_s12  ;;  %p962_p8 = scmp.lt.s32.totalorder %s956_s12, %s956_s12 }
 0x27b   :  { %465 = vst [vmem:[#allocation13] sm:$0xff] %v446_v4  ;;  %467 = vst [vmem:[#allocation13 + $0x10] sm:$0xff] %v456_v5 }
 0x27c   :  { %p963_p9 = por %p962_p8, %p961_p7 }
 0x27e   :  { %p964_p10 = pnand %p963_p9, %p957_p6 }
 0x280   :  { %967 = shalt.err (!%p964_p10)
}
 0x281   :  { %s968_s2 = scalar_lea.hbm %s1202_s8, 512 }
 0x282   :  { %p969_p11 = scmp.ne.s32.totalorder %s1202_s8, %s968_s2  ;;  %p972_p12 = scmp.lt.u32.totalorder %s968_s2, %s1202_s8 }
 0x284   :  { %p974_p13 = pnand %p972_p12, %p969_p11 }
 0x286   :  { %977 = shalt.err (!%p974_p13)
}
 0x287   :  { %504 = dma.vmem_to_hbm [thread:$0]  %s499_s11, 512, %s1202_s8, [#allocation12], %s990_s17, %s990_s17, %s991_s18  }
 0x288   :  { %984 = dma.done.wait [#allocation4], 512  }
 0x289   :  { %985 = vsyncadd [#allocation4], 4294966784 }
 0x28a   :  { %986 = dma.done.wait [#allocation12], 1024  }
 0x28b   :  { %987 = vsyncadd [#allocation12], 4294966272 }
 0x28c   :  { %514 = vsyncpa [#allocation3], 1 }
 0x28d   :  { %515 = vsyncpa [#allocation6], 1 }
 0x28e   :  { %516 = vsyncpa [#allocation9], 1 }
 0x28f   :  { %517 = vsyncpa [#allocation4], 1 }
 0x290   :  { %518 = vsyncpa [#allocation12], 1 }

</bundles_post_ra>
